<compile_context>
chip_gen: v7x
topology: tpu7x:2x2x1
jax: 0.10.0
libtpu: 0.0.40
codegen_flags: <defaults>
</compile_context>

<pallas_src>
import jax
import jax.numpy as jnp
from jax.experimental import pallas as pl
from jax.experimental.pallas import tpu as pltpu

_MIB = 1024 * 1024


def _scaling_kernel(x_ref, shift_ref, inv_ref, o_ref):
    # x_ref / o_ref: VMEM (row_block, lane_block)
    # shift_ref / inv_ref: VMEM (row_block, 1), f32 per-row (per (n, c)) values.
    x = x_ref[...].astype(jnp.float32)
    o_ref[...] = ((x - shift_ref[...]) * inv_ref[...]).astype(o_ref.dtype)


def _device_kind():
    try:
        return jax.devices()[0].device_kind.lower()
    except Exception:
        return ""


def _choose_blocks(rows, hw, itemsize, c):
    """Pick (row_block, lane_block) for the (rows, hw) view.

    lane_block is a multiple of 128 (or the full extent when hw < 128);
    row_block is either the full `rows` extent or a multiple of the sublane
    packing, so the BlockSpec (8,128) constraint holds.  Block bytes are
    capped per generation so the double-buffered in+out working set (~4x
    block) stays well inside the scoped-VMEM limit.
    """
    kind = _device_kind()
    is_v7x = "v7" in kind
    max_block_bytes = 6 * _MIB if is_v7x else 4 * _MIB

    sub = {4: 8, 2: 16, 1: 32}.get(itemsize, 8)

    # Row tiling only when a full-rows 128-lane block would blow the budget.
    if rows * 128 * itemsize <= max_block_bytes:
        row_block = rows
    else:
        max_rows = max_block_bytes // (128 * itemsize)
        row_block = max(sub, (max_rows // sub) * sub)
        # Prefer whole channels per block when that keeps sublane alignment.
        if c > 0 and row_block >= c and ((row_block // c) * c) % sub == 0:
            row_block = (row_block // c) * c
        row_block = min(row_block, rows)

    if hw < 128:
        # Full-extent last dim satisfies the BlockSpec constraint; a single
        # (masked) narrow block is unavoidable for tiny spatial sizes.
        lane = hw
    else:
        lane_budget = (max_block_bytes // (row_block * itemsize) // 128) * 128
        hw_lanes = pl.cdiv(hw, 128) * 128
        lane = int(max(128, min(hw_lanes, lane_budget)))

        # Only force a >=2-step grid where two TensorCores exist (v7x); keep
        # the halved block >= ~1 MiB so the split stays worthwhile.
        n_steps = pl.cdiv(rows, row_block) * pl.cdiv(hw, lane)
        if is_v7x and n_steps == 1 and hw >= 256:
            half = pl.cdiv(pl.cdiv(hw, 2), 128) * 128
            if row_block * half * itemsize >= _MIB:
                lane = int(half)

    return int(row_block), int(lane)


def scaling_layer(inp, shift, scale):
    """inp: (N, C, H, W); shift/scale: (C,). Returns (inp - shift) / scale."""
    n, c, h, w = inp.shape
    assert shift.shape == (c,) and scale.shape == (c,)

    rows = n * c
    hw = h * w
    itemsize = jnp.dtype(inp.dtype).itemsize

    # Lane-dense 2-D view; per-channel params expanded to per-row f32 vectors
    # (kept in f32 even for bf16 inputs: the in-kernel upcast is free under
    # the HBM roofline and avoids low-precision reciprocal error).
    x2 = inp.reshape(rows, hw)
    shift_rows = jnp.broadcast_to(
        shift.astype(jnp.float32)[None, :], (n, c)).reshape(rows, 1)
    inv_rows = jnp.broadcast_to(
        (1.0 / scale.astype(jnp.float32))[None, :], (n, c)).reshape(rows, 1)

    row_block, lane = _choose_blocks(rows, hw, itemsize, c)
    grid = (pl.cdiv(rows, row_block), pl.cdiv(hw, lane))

    x_spec = pl.BlockSpec((row_block, lane), lambda r, s: (r, s))
    p_spec = pl.BlockSpec((row_block, 1), lambda r, s: (r, 0))
    o_spec = pl.BlockSpec((row_block, lane), lambda r, s: (r, s))

    out2 = pl.pallas_call(
        _scaling_kernel,
        out_shape=jax.ShapeDtypeStruct((rows, hw), inp.dtype),
        grid_spec=pl.GridSpec(
            grid=grid,
            in_specs=[x_spec, p_spec, p_spec],
            out_specs=o_spec,
        ),
        compiler_params=pltpu.CompilerParams(
            dimension_semantics=("parallel", "parallel"),
            vmem_limit_bytes=32 * _MIB,
        ),
    )(x2, shift_rows, inv_rows)

    return out2.reshape(n, c, h, w)


if __name__ == "__main__":
    key = jax.random.PRNGKey(0)
    x = jax.random.normal(key, (2, 3, 16, 16), dtype=jnp.float32)

    # Buffers exactly as registered in ScalingLayer.__init__ (identity affine).
    shift = jnp.array([0.0, 0.0, 0.0], dtype=jnp.float32)
    scale = jnp.array([1.0, 1.0, 1.0], dtype=jnp.float32)

    out = jax.block_until_ready(scaling_layer(x, shift, scale))
    ref = (x - shift[None, :, None, None]) / scale[None, :, None, None]
    assert out.shape == x.shape
    assert jnp.allclose(out, ref, atol=1e-5, rtol=1e-5)

    # Non-trivial per-channel values (exercises the per-row broadcast and the
    # reciprocal-multiply path).
    shift2 = jnp.array([-0.030, -0.088, -0.188], dtype=jnp.float32)
    scale2 = jnp.array([0.458, 0.448, 0.450], dtype=jnp.float32)
    out2 = jax.block_until_ready(scaling_layer(x, shift2, scale2))
    ref2 = (x - shift2[None, :, None, None]) / scale2[None, :, None, None]
    assert jnp.allclose(out2, ref2, atol=1e-5, rtol=1e-5)

    # Non-128-multiple spatial size (ragged / masked-edge path, hw = 100).
    x3 = jax.random.normal(jax.random.PRNGKey(1), (2, 3, 10, 10), dtype=jnp.float32)
    out3 = jax.block_until_ready(scaling_layer(x3, shift2, scale2))
    ref3 = (x3 - shift2[None, :, None, None]) / scale2[None, :, None, None]
    assert jnp.allclose(out3, ref3, atol=1e-5, rtol=1e-5)

    print("KERNEL_OK")
</pallas_src>

<mosaic_0001>
module attributes {stable_mosaic.version = 11 : i64} {
  func.func @_scaling_kernel(%arg0: i32, %arg1: i32, %arg2: memref<6x256xf32, #tpu.memory_space<vmem>>, %arg3: memref<6x1xf32, #tpu.memory_space<vmem>>, %arg4: memref<6x1xf32, #tpu.memory_space<vmem>>, %arg5: memref<6x256xf32, #tpu.memory_space<vmem>>) attributes {dimension_semantics = [#tpu.dimension_semantics<parallel>, #tpu.dimension_semantics<parallel>], iteration_bounds = array<i64: 1, 1>, scalar_prefetch = 0 : i64, scratch_operands = 0 : i64, tpu.core_type = #tpu.core_type<tc>, window_params = [{transform_indices = @transform_0, window_bounds = array<i64: 6, 256>}, {transform_indices = @transform_1, window_bounds = array<i64: 6, 1>}, {transform_indices = @transform_2, window_bounds = array<i64: 6, 1>}, {transform_indices = @transform_3, window_bounds = array<i64: 6, 256>}]} {
    %c0 = arith.constant 0 : index
    %c0_0 = arith.constant 0 : index
    %0 = vector.load %arg2[%c0, %c0_0] : memref<6x256xf32, #tpu.memory_space<vmem>>, vector<6x256xf32>
    %c0_1 = arith.constant 0 : index
    %c0_2 = arith.constant 0 : index
    %1 = vector.load %arg3[%c0_1, %c0_2] : memref<6x1xf32, #tpu.memory_space<vmem>>, vector<6x1xf32>
    %2 = vector.broadcast %1 : vector<6x1xf32> to vector<6x256xf32>
    %3 = arith.subf %0, %2 : vector<6x256xf32>
    %c0_3 = arith.constant 0 : index
    %c0_4 = arith.constant 0 : index
    %4 = vector.load %arg4[%c0_3, %c0_4] : memref<6x1xf32, #tpu.memory_space<vmem>>, vector<6x1xf32>
    %5 = vector.broadcast %4 : vector<6x1xf32> to vector<6x256xf32>
    %6 = arith.mulf %3, %5 : vector<6x256xf32>
    %c0_5 = arith.constant 0 : index
    %c0_6 = arith.constant 0 : index
    %7 = vector.load %arg5[%c0_5, %c0_6] : memref<6x256xf32, #tpu.memory_space<vmem>>, vector<6x256xf32>
    tpu.vector_store %arg5[%c0_5, %c0_6], %6 {strides = array<i32>} : memref<6x256xf32, #tpu.memory_space<vmem>>, vector<6x256xf32>,
    return
  }
  func.func @transform_0(%arg0: i32, %arg1: i32) -> (i32, i32) {
    %c0_i32 = arith.constant 0 : i32
    return %arg0, %arg1 : i32, i32
  }
  func.func @transform_1(%arg0: i32, %arg1: i32) -> (i32, i32) {
    %c0_i32 = arith.constant 0 : i32
    %c0_i32_0 = arith.constant 0 : i32
    return %arg0, %c0_i32 : i32, i32
  }
  func.func @transform_2(%arg0: i32, %arg1: i32) -> (i32, i32) {
    %c0_i32 = arith.constant 0 : i32
    %c0_i32_0 = arith.constant 0 : i32
    return %arg0, %c0_i32 : i32, i32
  }
  func.func @transform_3(%arg0: i32, %arg1: i32) -> (i32, i32) {
    %c0_i32 = arith.constant 0 : i32
    return %arg0, %arg1 : i32, i32
  }
}

</mosaic_0001>

<bundles_post_ra>
// kernel: tpu_custom_call.1
= control target key start
LH: loop header
LB: loop body
LE: loop exit
PB: predicated region body
PF: predicated region fallthrough
CT: control target
= control target key end

     0   :  { %v76_v1 = vmov 0   ;;  %s122_s0 = inlined_call_operand.vmem [shape: f32[6,256], index: 0, kind: input, shape index: {}]   ;;  %s123_s1 = inlined_call_operand.vmem [shape: f32[6,1], index: 1, kind: input, shape index: {}]   ;;  %s124_s2 = inlined_call_operand.vmem [shape: f32[6,1], index: 2, kind: input, shape index: {}]   ;;  %s125_s3 = inlined_call_operand.hbm [shape: f32[6,256], index: 3, kind: output, shape index: {}]  }
   0x1   :  { %v17_v0 = vld [vmem:[%s123_s1] sm:$0x3f]  ;;  %51 = vset.pattern.permute.xlu0 %v76_v1 }
   0x2   :  { %8 = vsyncpa [#allocation3], 0  ;;  %20 = vperm.xlu0 %51, %v17_v0   ;;  %v25_v2 = vld [vmem:[%s124_s2] sm:$0x3f]  ;;  %v16_v5 = vld [vmem:[%s122_s0 + $0x8] sm:$0x3f] }
   0x3   :  { %v15_v4 = vld [vmem:[%s122_s0] sm:$0x3f]  ;;  %s77_s20 = smov [#allocation2]  }
   0x4   :  { %s41_s1 = sshll.u32 %s77_s20, 4  ;;  %s42_s1 = int_to_ptr.vmem [resolvable:$true] %s41_s1 }
   0x5   :  { %s52_s2 = scalar_lea.vmem %s42_s1, 256  ;;  %p57_p1 = scmp.lt.s32.totalorder %s42_s1, %s42_s1 }
   0x6   :  { %28 = vperm.xlu0 %51, %v25_v2   ;;  %p53_p0 = scmp.ne.s32.totalorder %s42_s1, %s52_s2  ;;  %p58_p2 = scmp.lt.s32.totalorder %s52_s2, %s52_s2 }
   0x8   :  { %p59_p3 = por %p58_p2, %p57_p1 }
   0xa   :  { %p60_p4 = pnand %p59_p3, %p53_p0 }
  0x81   :  { %v21_v3 = vpop.permute.xlu0 %20 }
  0x82   :  { %v23_v6 = vsub.f32 %v15_v4, %v21_v3  ;;  %v24_v7 = vsub.f32 %v16_v5, %v21_v3 }
  0x85   :  { %v29_v8 = vpop.permute.xlu0 %28 }
  0x86   :  { %v31_v9 = vmul.f32 %v29_v8, %v23_v6  ;;  %v32_v10 = vmul.f32 %v29_v8, %v24_v7 }
  0x88   :  { %33 = vst [vmem:[#allocation2] sm:$0x3f] %v31_v9  ;;  %34 = vst [vmem:[#allocation2 + $0x8] sm:$0x3f] %v32_v10 }
  0x89   :  { %63 = shalt.err (!%p60_p4)
}
  0x8a   :  { %s64_s0 = scalar_lea.hbm %s125_s3, 256 }
  0x8b   :  { %p65_p5 = scmp.ne.s32.totalorder %s125_s3, %s64_s0  ;;  %p68_p6 = scmp.lt.u32.totalorder %s64_s0, %s125_s3 }
  0x8d   :  { %p70_p7 = pnand %p68_p6, %p65_p5 }
  0x8f   :  { %73 = shalt.err (!%p70_p7)
}
  0x90   :  { %44 = dma.vmem_to_hbm [thread:$0]  %s42_s1, 256, %s125_s3, [#allocation3]  }
  0x91   :  { %74 = dma.done.wait [#allocation3], 256  }
  0x92   :  { %75 = vsyncadd [#allocation3], 4294967040 }
  0x93   :  { %48 = vsyncpa [#allocation3], 1 }

</bundles_post_ra>
